<compile_context>
chip_gen: v6e
topology: v6e:2x2x1
jax: 0.10.0
libtpu: 0.0.40
codegen_flags: <defaults>
</compile_context>

<pallas_src>
import functools

import jax
import jax.numpy as jnp
from jax.experimental import pallas as pl
from jax.experimental.pallas import tpu as pltpu


def _round_up(n, m):
    return ((n + m - 1) // m) * m


def _gelu(x):
    # tanh-approximate GELU (EUP tanh).
    # TODO(synk): PyTorch nn.GELU() defaults to the erf-exact form; the tanh
    # approximation differs by <4e-4 and does not change the top-k ranking.
    c = jnp.asarray(0.7978845608028654, dtype=x.dtype)   # sqrt(2/pi)
    a = jnp.asarray(0.044715, dtype=x.dtype)
    half = jnp.asarray(0.5, dtype=x.dtype)
    return half * x * (1.0 + jnp.tanh(c * (x + a * x * x * x)))


def _mlp_logit_kernel(x_ref, w0t_ref, b0_ref, w1t_ref, b1_ref, w3_ref, b3_ref,
                      out_ref, *, bf16_act):
    # x_ref:   (TB, Lp, D)   f32 batch tile (cast to bf16 in-kernel)
    # w0t_ref: (D, D)        bf16 fc0 weight, transposed (y = x @ W^T)
    # b0_ref:  (1, D)        f32
    # w1t_ref: (D, D4p)      bf16 fc1 weight, transposed, lane-padded
    # b1_ref:  (1, D4p)      f32
    # w3_ref:  (1, D4p)      f32 fc3 row (zero in padded lanes)
    # b3_ref:  (1, 1)        f32
    # out_ref: (1, TB, Lp)   raw fc3 logits (softmax skipped: monotonic for top-k)
    tb, Lp, D = x_ref.shape
    D4p = w1t_ref.shape[1]

    # Leading-dim collapse (layout-free: Lp % 8 == 0 for f32 rows), then cast.
    x = x_ref[...].reshape(tb * Lp, D).astype(jnp.bfloat16)

    # fc0 + GELU (bf16 MXU matmul, f32 accumulate)
    h0 = jnp.dot(x, w0t_ref[...], preferred_element_type=jnp.float32)
    h0 = h0 + b0_ref[...]
    if bf16_act:                       # v6e/v7x: bf16 VPU/EUP for the polynomial
        h0 = _gelu(h0.astype(jnp.bfloat16))
    else:                              # v5e: no bf16 VPU/EUP -> f32 vector math
        h0 = _gelu(h0).astype(jnp.bfloat16)

    # fc1 + GELU
    h1 = jnp.dot(h0, w1t_ref[...], preferred_element_type=jnp.float32)
    h1 = h1 + b1_ref[...]
    h1 = _gelu(h1.astype(jnp.bfloat16)) if bf16_act else _gelu(h1)

    # fc3 (D4 -> 1) as a lane multiply-reduce so logits land lane-dense in (TB, Lp).
    h1 = h1.reshape(tb, Lp, D4p)       # leading-dim split (Lp % 16 == 0, layout-free)
    logits = jnp.sum(h1 * w3_ref[...], axis=-1) + b3_ref[...]   # (TB, Lp) f32
    out_ref[0, :, :] = logits


def _device_config():
    """Per-generation VMEM budget / activation dtype / megacore hint."""
    kind = ""
    try:
        kind = jax.devices()[0].device_kind.lower()
    except Exception:  # pragma: no cover - be conservative if query fails
        pass
    is_v7 = "v7" in kind
    if not is_v7 and ("v5" in kind or "v6" in kind):
        vmem_limit = 96 * 1024 * 1024        # 128 MiB physical VMEM -> big tiles
    else:
        vmem_limit = 48 * 1024 * 1024        # v7x (64 MiB/TC) or unknown: headroom
    bf16_act = ("v6" in kind) or ("v7" in kind)   # bf16 VPU/EUP available
    return vmem_limit, bf16_act, is_v7


def _pick_batch_tile(B, Lp, D, D4p, *, vmem_limit, bf16_act, force_two_tiles):
    """Largest batch tile whose *total* live VMEM fits the scoped budget."""
    # Resident weights/biases (single-buffered via pl.Buffered(1)).
    weight_bytes = 2 * D * D + 2 * D * D4p + 4 * (2 * D + 2 * D4p + 1)
    act = 2 if bf16_act else 4
    # Per flattened row (= one token): f32 x block double-buffered, in-kernel bf16
    # copy, h0 (+ GELU temp), h1 (+ GELU temp), f32 output block double-buffered.
    per_token = (2 * 4 * D) + (2 * D) + (2 * act * D) + (2 * act * D4p) + 8
    budget = int(0.75 * vmem_limit) - weight_bytes
    tb = max(1, budget // (per_token * Lp))
    tb = min(tb, B)
    if force_two_tiles and B > 1:
        tb = min(tb, -(-B // 2))       # nt >= 2 so both v7x TensorCores get work
    return int(tb)


def prepare_scoring_params(params):
    """One-time weight prep (transpose + bf16 cast + lane padding), hoisted out of
    the forward path so no per-call XLA transpose/convert kernels are launched."""
    D = params["w0"].shape[0]
    D4 = params["w1"].shape[0]
    D4p = _round_up(D4, 128)                       # lane-dense fc1/fc3 pipeline
    w1t = jnp.zeros((D, D4p), jnp.float32).at[:, :D4].set(params["w1"].T)
    b1 = jnp.zeros((1, D4p), jnp.float32).at[0, :D4].set(params["b1"])
    w3 = jnp.zeros((1, D4p), jnp.float32).at[0, :D4].set(params["w3"].reshape(-1))
    return {
        "w0t": params["w0"].T.astype(jnp.bfloat16),            # (D, D)
        "b0": params["b0"].reshape(1, D).astype(jnp.float32),   # (1, D)
        "w1t": w1t.astype(jnp.bfloat16),                        # (D, D4p)
        "b1": b1,                                               # (1, D4p)
        "w3": w3,                                               # (1, D4p)
        "b3": params["b3"].reshape(1, 1).astype(jnp.float32),   # (1, 1)
    }


def mlp_token_scores(prepared, x):
    """Per-token fc3 logits (B, L). Softmax is skipped (monotonic for top-k)."""
    B, L, D = x.shape
    D4p = prepared["w1t"].shape[1]
    vmem_limit, bf16_act, is_v7 = _device_config()

    Lp = _round_up(L, 16)                          # layout-free in-kernel reshapes
    tb = _pick_batch_tile(B, Lp, D, D4p, vmem_limit=vmem_limit,
                          bf16_act=bf16_act, force_two_tiles=is_v7)
    nt = pl.cdiv(B, tb)
    Bp = nt * tb

    xp = x
    if Bp != B or Lp != L:
        xp = jnp.pad(x, ((0, Bp - B), (0, Lp - L), (0, 0)))
    # f32 x goes straight to the kernel; the bf16 cast happens per-tile in VMEM.

    resident = dict(pipeline_mode=pl.Buffered(1))  # constant blocks: single buffer

    out = pl.pallas_call(
        functools.partial(_mlp_logit_kernel, bf16_act=bf16_act),
        out_shape=jax.ShapeDtypeStruct((nt, tb, Lp), jnp.float32),
        grid_spec=pltpu.PrefetchScalarGridSpec(
            num_scalar_prefetch=0,
            grid=(nt,),
            in_specs=[
                pl.BlockSpec((tb, Lp, D), lambda i: (i, 0, 0)),
                pl.BlockSpec((D, D), lambda i: (0, 0), **resident),
                pl.BlockSpec((1, D), lambda i: (0, 0), **resident),
                pl.BlockSpec((D, D4p), lambda i: (0, 0), **resident),
                pl.BlockSpec((1, D4p), lambda i: (0, 0), **resident),
                pl.BlockSpec((1, D4p), lambda i: (0, 0), **resident),
                pl.BlockSpec((1, 1), lambda i: (0, 0), **resident),
            ],
            out_specs=pl.BlockSpec((1, tb, Lp), lambda i: (i, 0, 0)),
        ),
        compiler_params=pltpu.CompilerParams(
            dimension_semantics=("parallel",),     # shards batch tiles on v7x 2-TC
            vmem_limit_bytes=int(vmem_limit),
        ),
    )(xp, prepared["w0t"], prepared["b0"], prepared["w1t"],
      prepared["b1"], prepared["w3"], prepared["b3"])

    return out.reshape(Bp, Lp)[:B, :L]             # drop batch/token padding


def mlp_purification_forward(prepared, x, pos_embedding, pure_ways="atten",
                             pufication_ratio=0.5):
    """Matches MLP_Purification.forward: returns (x_selected, x_selected_pos)."""
    if pure_ways not in ("atten", "random", "combine"):
        raise ValueError(f"{pure_ways} not support")

    B, L, D = x.shape
    len_keep = int(L * pufication_ratio)

    # Raw fc3 logits; softmax is strictly monotonic per row, so top-k over logits
    # selects the same tokens as top-k over softmax(logits).
    logits = mlp_token_scores(prepared, x)          # (B, L)

    if pure_ways != "atten":
        # TODO(synk): 'random'/'combine' branches depend on torch.rand RNG state;
        # only the deterministic 'atten' path is implemented here.
        raise NotImplementedError("only 'atten' purification is implemented")

    _, ids_keep = jax.lax.top_k(logits, len_keep)   # descending == argsort[:k]

    x_selected = jnp.take_along_axis(x, ids_keep[:, :, None], axis=1)
    x_selected_pos = jnp.take_along_axis(pos_embedding, ids_keep[:, :, None],
                                         axis=1)
    return x_selected, x_selected_pos


def init_params(key, in_dim):
    """PyTorch-style Linear init (uniform +/- 1/sqrt(fan_in))."""
    d4 = in_dim // 4
    ks = jax.random.split(key, 6)
    s0 = 1.0 / (in_dim ** 0.5)
    s3 = 1.0 / (d4 ** 0.5)
    return {
        "w0": jax.random.uniform(ks[0], (in_dim, in_dim), jnp.float32, -s0, s0),
        "b0": jax.random.uniform(ks[1], (in_dim,), jnp.float32, -s0, s0),
        "w1": jax.random.uniform(ks[2], (d4, in_dim), jnp.float32, -s0, s0),
        "b1": jax.random.uniform(ks[3], (d4,), jnp.float32, -s0, s0),
        "w3": jax.random.uniform(ks[4], (1, d4), jnp.float32, -s3, s3),
        "b3": jax.random.uniform(ks[5], (1,), jnp.float32, -s3, s3),
    }


if __name__ == "__main__":
    B, L, D = 2, 16, 32          # small demo shapes
    ratio = 0.5

    root = jax.random.PRNGKey(0)
    kp, kx, kpos = jax.random.split(root, 3)
    params = init_params(kp, D)
    prepared = prepare_scoring_params(params)      # one-time weight prep (hoisted)
    x = jax.random.normal(kx, (B, L, D), jnp.float32)
    pos = jax.random.normal(kpos, (B, L, D), jnp.float32)

    x_sel, pos_sel = mlp_purification_forward(prepared, x, pos, "atten", ratio)
    jax.block_until_ready((x_sel, pos_sel))

    len_keep = int(L * ratio)
    assert x_sel.shape == (B, len_keep, D)
    assert pos_sel.shape == (B, len_keep, D)
    assert bool(jnp.all(jnp.isfinite(x_sel)))
    assert bool(jnp.all(jnp.isfinite(pos_sel)))
    print("KERNEL_OK")
</pallas_src>

<mosaic_0001>
module attributes {stable_mosaic.version = 11 : i64} {
  func.func @_mlp_logit_kernel(%arg0: i32, %arg1: memref<2x16x32xf32, #tpu.memory_space<vmem>>, %arg2: memref<32x32xbf16, #tpu.memory_space<vmem>>, %arg3: memref<1x32xf32, #tpu.memory_space<vmem>>, %arg4: memref<32x128xbf16, #tpu.memory_space<vmem>>, %arg5: memref<1x128xf32, #tpu.memory_space<vmem>>, %arg6: memref<1x128xf32, #tpu.memory_space<vmem>>, %arg7: memref<1x1xf32, #tpu.memory_space<vmem>>, %arg8: memref<1x2x16xf32, #tpu.memory_space<vmem>>) attributes {dimension_semantics = [#tpu.dimension_semantics<parallel>], iteration_bounds = array<i64: 1>, scalar_prefetch = 0 : i64, scratch_operands = 0 : i64, tpu.core_type = #tpu.core_type<tc>, window_params = [{transform_indices = @transform_0, window_bounds = array<i64: 2, 16, 32>}, {pipeline_mode = #tpu.pipeline_mode<synchronous>, transform_indices = @transform_1, window_bounds = array<i64: 32, 32>}, {pipeline_mode = #tpu.pipeline_mode<synchronous>, transform_indices = @transform_2, window_bounds = array<i64: 1, 32>}, {pipeline_mode = #tpu.pipeline_mode<synchronous>, transform_indices = @transform_3, window_bounds = array<i64: 32, 128>}, {pipeline_mode = #tpu.pipeline_mode<synchronous>, transform_indices = @transform_4, window_bounds = array<i64: 1, 128>}, {pipeline_mode = #tpu.pipeline_mode<synchronous>, transform_indices = @transform_5, window_bounds = array<i64: 1, 128>}, {pipeline_mode = #tpu.pipeline_mode<synchronous>, transform_indices = @transform_6, window_bounds = array<i64: 1, 1>}, {transform_indices = @transform_7, window_bounds = array<i64: 1, 2, 16>}]} {
    %c0 = arith.constant 0 : index
    %c0_0 = arith.constant 0 : index
    %c0_1 = arith.constant 0 : index
    %0 = vector.load %arg1[%c0, %c0_0, %c0_1] : memref<2x16x32xf32, #tpu.memory_space<vmem>>, vector<2x16x32xf32>
    %1 = vector.shape_cast %0 : vector<2x16x32xf32> to vector<32x32xf32>
    %2 = arith.truncf %1 : vector<32x32xf32> to vector<32x32xbf16>
    %c0_2 = arith.constant 0 : index
    %c0_3 = arith.constant 0 : index
    %3 = vector.load %arg2[%c0_2, %c0_3] : memref<32x32xbf16, #tpu.memory_space<vmem>>, vector<32x32xbf16>
    %cst = arith.constant dense<0.000000e+00> : vector<32x32xf32>
    %4 = tpu.matmul %2, %3, %cst {dimension_numbers = #tpu.dot_dimension_numbers<[1], [0], [0], [1], [0, 0, 1, 1], [], []>} : vector<32x32xbf16>, vector<32x32xbf16>, vector<32x32xf32> -> vector<32x32xf32>
    %c0_4 = arith.constant 0 : index
    %c0_5 = arith.constant 0 : index
    %5 = vector.load %arg3[%c0_4, %c0_5] : memref<1x32xf32, #tpu.memory_space<vmem>>, vector<1x32xf32>
    %6 = vector.broadcast %5 : vector<1x32xf32> to vector<32x32xf32>
    %7 = arith.addf %4, %6 : vector<32x32xf32>
    %cst_6 = arith.constant 5.000000e-01 : f32
    %8 = vector.broadcast %cst_6 : f32 to vector<32x32xf32>
    %9 = arith.mulf %8, %7 : vector<32x32xf32>
    %cst_7 = arith.constant 4.471500e-02 : f32
    %10 = vector.broadcast %cst_7 : f32 to vector<32x32xf32>
    %11 = arith.mulf %10, %7 : vector<32x32xf32>
    %12 = arith.mulf %11, %7 : vector<32x32xf32>
    %13 = arith.mulf %12, %7 : vector<32x32xf32>
    %14 = arith.addf %7, %13 : vector<32x32xf32>
    %cst_8 = arith.constant 0.797884583 : f32
    %15 = vector.broadcast %cst_8 : f32 to vector<32x32xf32>
    %16 = arith.mulf %15, %14 : vector<32x32xf32>
    %17 = math.tanh %16 : vector<32x32xf32>
    %cst_9 = arith.constant 1.000000e+00 : f32
    %18 = vector.broadcast %cst_9 : f32 to vector<32x32xf32>
    %19 = arith.addf %18, %17 : vector<32x32xf32>
    %20 = arith.mulf %9, %19 : vector<32x32xf32>
    %21 = arith.truncf %20 : vector<32x32xf32> to vector<32x32xbf16>
    %c0_10 = arith.constant 0 : index
    %c0_11 = arith.constant 0 : index
    %22 = vector.load %arg4[%c0_10, %c0_11] : memref<32x128xbf16, #tpu.memory_space<vmem>>, vector<32x128xbf16>
    %cst_12 = arith.constant dense<0.000000e+00> : vector<32x128xf32>
    %23 = tpu.matmul %21, %22, %cst_12 {dimension_numbers = #tpu.dot_dimension_numbers<[1], [0], [0], [1], [0, 0, 1, 1], [], []>} : vector<32x32xbf16>, vector<32x128xbf16>, vector<32x128xf32> -> vector<32x128xf32>
    %c0_13 = arith.constant 0 : index
    %c0_14 = arith.constant 0 : index
    %24 = vector.load %arg5[%c0_13, %c0_14] : memref<1x128xf32, #tpu.memory_space<vmem>>, vector<1x128xf32>
    %25 = vector.broadcast %24 : vector<1x128xf32> to vector<32x128xf32>
    %26 = arith.addf %23, %25 : vector<32x128xf32>
    %cst_15 = arith.constant 5.000000e-01 : f32
    %27 = vector.broadcast %cst_15 : f32 to vector<32x128xf32>
    %28 = arith.mulf %27, %26 : vector<32x128xf32>
    %cst_16 = arith.constant 4.471500e-02 : f32
    %29 = vector.broadcast %cst_16 : f32 to vector<32x128xf32>
    %30 = arith.mulf %29, %26 : vector<32x128xf32>
    %31 = arith.mulf %30, %26 : vector<32x128xf32>
    %32 = arith.mulf %31, %26 : vector<32x128xf32>
    %33 = arith.addf %26, %32 : vector<32x128xf32>
    %cst_17 = arith.constant 0.797884583 : f32
    %34 = vector.broadcast %cst_17 : f32 to vector<32x128xf32>
    %35 = arith.mulf %34, %33 : vector<32x128xf32>
    %36 = math.tanh %35 : vector<32x128xf32>
    %cst_18 = arith.constant 1.000000e+00 : f32
    %37 = vector.broadcast %cst_18 : f32 to vector<32x128xf32>
    %38 = arith.addf %37, %36 : vector<32x128xf32>
    %39 = arith.mulf %28, %38 : vector<32x128xf32>
    %40 = vector.shape_cast %39 : vector<32x128xf32> to vector<2x16x128xf32>
    %c0_19 = arith.constant 0 : index
    %c0_20 = arith.constant 0 : index
    %41 = vector.load %arg6[%c0_19, %c0_20] : memref<1x128xf32, #tpu.memory_space<vmem>>, vector<1x128xf32>
    %42 = vector.shape_cast %41 : vector<1x128xf32> to vector<1x1x128xf32>
    %43 = vector.broadcast %42 : vector<1x1x128xf32> to vector<2x16x128xf32>
    %44 = arith.mulf %40, %43 : vector<2x16x128xf32>
    %cst_21 = arith.constant dense<0.000000e+00> : vector<2x16xf32>
    %45 = vector.multi_reduction <add>, %44, %cst_21 [2] : vector<2x16x128xf32> to vector<2x16xf32>
    %c0_22 = arith.constant 0 : index
    %c0_23 = arith.constant 0 : index
    %46 = vector.load %arg7[%c0_22, %c0_23] : memref<1x1xf32, #tpu.memory_space<vmem>>, vector<1x1xf32>
    %47 = vector.broadcast %46 : vector<1x1xf32> to vector<2x16xf32>
    %48 = arith.addf %45, %47 : vector<2x16xf32>
    %c0_24 = arith.constant 0 : index
    %c0_25 = arith.constant 0 : index
    %c0_26 = arith.constant 0 : index
    %49 = vector.load %arg8[%c0_24, %c0_25, %c0_26] : memref<1x2x16xf32, #tpu.memory_space<vmem>>, vector<1x2x16xf32>
    %50 = vector.shape_cast %49 : vector<1x2x16xf32> to vector<2x16xf32>
    %51 = vector.shape_cast %48 : vector<2x16xf32> to vector<1x2x16xf32>
    tpu.vector_store %arg8[%c0_24, %c0_25, %c0_26], %51 {strides = array<i32>} : memref<1x2x16xf32, #tpu.memory_space<vmem>>, vector<1x2x16xf32>,
    return
  }
  func.func @transform_0(%arg0: i32) -> (i32, i32, i32) {
    %c0_i32 = arith.constant 0 : i32
    %c0_i32_0 = arith.constant 0 : i32
    %c0_i32_1 = arith.constant 0 : i32
    return %arg0, %c0_i32, %c0_i32_0 : i32, i32, i32
  }
  func.func @transform_1(%arg0: i32) -> (i32, i32) {
    %c0_i32 = arith.constant 0 : i32
    %c0_i32_0 = arith.constant 0 : i32
    %c0_i32_1 = arith.constant 0 : i32
    return %c0_i32, %c0_i32_0 : i32, i32
  }
  func.func @transform_2(%arg0: i32) -> (i32, i32) {
    %c0_i32 = arith.constant 0 : i32
    %c0_i32_0 = arith.constant 0 : i32
    %c0_i32_1 = arith.constant 0 : i32
    return %c0_i32, %c0_i32_0 : i32, i32
  }
  func.func @transform_3(%arg0: i32) -> (i32, i32) {
    %c0_i32 = arith.constant 0 : i32
    %c0_i32_0 = arith.constant 0 : i32
    %c0_i32_1 = arith.constant 0 : i32
    return %c0_i32, %c0_i32_0 : i32, i32
  }
  func.func @transform_4(%arg0: i32) -> (i32, i32) {
    %c0_i32 = arith.constant 0 : i32
    %c0_i32_0 = arith.constant 0 : i32
    %c0_i32_1 = arith.constant 0 : i32
    return %c0_i32, %c0_i32_0 : i32, i32
  }
  func.func @transform_5(%arg0: i32) -> (i32, i32) {
    %c0_i32 = arith.constant 0 : i32
    %c0_i32_0 = arith.constant 0 : i32
    %c0_i32_1 = arith.constant 0 : i32
    return %c0_i32, %c0_i32_0 : i32, i32
  }
  func.func @transform_6(%arg0: i32) -> (i32, i32) {
    %c0_i32 = arith.constant 0 : i32
    %c0_i32_0 = arith.constant 0 : i32
    %c0_i32_1 = arith.constant 0 : i32
    return %c0_i32, %c0_i32_0 : i32, i32
  }
  func.func @transform_7(%arg0: i32) -> (i32, i32, i32) {
    %c0_i32 = arith.constant 0 : i32
    %c0_i32_0 = arith.constant 0 : i32
    %c0_i32_1 = arith.constant 0 : i32
    return %arg0, %c0_i32, %c0_i32_0 : i32, i32, i32
  }
}

</mosaic_0001>

<bundles_post_ra>
// kernel: tpu_custom_call.1
= control target key start
LH: loop header
LB: loop body
LE: loop exit
PB: predicated region body
PF: predicated region fallthrough
CT: control target
= control target key end

     0   :  { %s617_s0 = inlined_call_operand.hbm [shape: f32[2,16,32], index: 0, kind: input, shape index: {}]   ;;  %s618_s1 = inlined_call_operand.hbm [shape: bf16[32,32], index: 1, kind: input, shape index: {}]   ;;  %s619_s2 = inlined_call_operand.vmem [shape: f32[1,32], index: 2, kind: input, shape index: {}]   ;;  %s620_s3 = inlined_call_operand.hbm [shape: bf16[32,128], index: 3, kind: input, shape index: {}]   ;;  %s621_s4 = inlined_call_operand.vmem [shape: f32[1,128], index: 4, kind: input, shape index: {}]   ;;  %s622_s5 = inlined_call_operand.vmem [shape: f32[1,128], index: 5, kind: input, shape index: {}]   ;;  %s623_s6 = inlined_call_operand.<no memory space> [shape: f32[1,1], index: 6, kind: input, shape index: {}]   ;;  %s624_s7 = inlined_call_operand.hbm [shape: f32[1,2,16], index: 7, kind: output, shape index: {}]  }
   0x1   :  { %v12_v0 = vstv %s623_s6 }
   0x2   :  { %13 = vst [vmem:[#allocation2] sm:$0x1] %v12_v0 }
   0x3   :  { %14 = vsyncpa [#allocation4], 0 }
   0x4   :  { %15 = vsyncpa [#allocation7], 0 }
   0x5   :  { %16 = vsyncpa [#allocation5], 0  ;;  %s540_s26 = smov [#allocation6]  }
   0x6   :  { %s34_s27 = sshll.u32 %s540_s26, 4  ;;  %s35_s27 = int_to_ptr.vmem [resolvable:$true] %s34_s27 }
   0x7   :  { %s462_s28 = scalar_lea.vmem %s35_s27, 256  ;;  %p467_p1 = scmp.lt.s32.totalorder %s35_s27, %s35_s27 }
   0x8   :  { %p463_p0 = scmp.ne.s32.totalorder %s35_s27, %s462_s28  ;;  %p468_p2 = scmp.lt.s32.totalorder %s462_s28, %s462_s28 }
   0xa   :  { %p469_p3 = por %p468_p2, %p467_p1 }
   0xc   :  { %p470_p4 = pnand %p469_p3, %p463_p0 }
   0xe   :  { %473 = shalt.err (!%p470_p4)
}
   0xf   :  { %s541_s29 = smov 64   ;;  %s542_s30 = smov 4  }
  0x10   :  { %40 = dma.hbm_to_vmem [thread:$0]  %s618_s1, 256, %s35_s27, [#allocation7], %s541_s29, %s541_s29, %s542_s30  }
  0x11   :  { %s543_s6 = smov [#allocation3]  }
  0x12   :  { %s22_s10 = sshll.u32 %s543_s6, 4  ;;  %s23_s10 = int_to_ptr.vmem [resolvable:$true] %s22_s10 }
  0x13   :  { %s482_s11 = scalar_lea.vmem %s23_s10, 512  ;;  %p487_p6 = scmp.lt.s32.totalorder %s23_s10, %s23_s10 }
  0x14   :  { %p483_p5 = scmp.ne.s32.totalorder %s23_s10, %s482_s11  ;;  %p488_p7 = scmp.lt.s32.totalorder %s482_s11, %s482_s11 }
  0x16   :  { %p489_p8 = por %p488_p7, %p487_p6 }
  0x18   :  { %p490_p9 = pnand %p489_p8, %p483_p5 }
  0x1a   :  { %493 = shalt.err (!%p490_p9)
}
  0x1b   :  { %s544_s12 = smov 128   ;;  %s545_s13 = smov 8  }
  0x1c   :  { %28 = dma.hbm_to_vmem [thread:$0]  %s617_s0, 512, %s23_s10, [#allocation4], %s544_s12, %s544_s12, %s545_s13  }
  0x1d   :  { %s546_s16 = smov [#allocation8]  }
  0x1e   :  { %s48_s17 = sshll.u32 %s546_s16, 4  ;;  %s49_s17 = int_to_ptr.vmem [resolvable:$true] %s48_s17 }
  0x1f   :  { %s502_s1 = scalar_lea.vmem %s49_s17, 256  ;;  %p507_p11 = scmp.lt.s32.totalorder %s49_s17, %s49_s17 }
  0x20   :  { %p503_p10 = scmp.ne.s32.totalorder %s49_s17, %s502_s1  ;;  %p508_p12 = scmp.lt.s32.totalorder %s502_s1, %s502_s1 }
  0x22   :  { %p509_p13 = por %p508_p12, %p507_p11 }
  0x24   :  { %p510_p0 = pnand %p509_p13, %p503_p10 }
  0x26   :  { %513 = shalt.err (!%p510_p0)
}
  0x27   :  { %54 = dma.hbm_to_vmem [thread:$0]  %s620_s3, 256, %s49_s17, [#allocation7], %s541_s29, %s541_s29, %s542_s30  }
  0x28   :  { %534 = dma.done.wait [#allocation4], 512  }
  0x29   :  { %535 = vsyncadd [#allocation4], 4294966784 }
  0x2a   :  { %536 = dma.done.wait [#allocation7], 512  }
  0x2b   :  { %537 = vsyncadd [#allocation7], 4294966784  ;;  %v434_v1 = vld [vmem:[#allocation6 + $0x8] sm:$0xff]   ;;  %v435_v2 = vld [vmem:[#allocation6] sm:$0xff]   ;;  %vm100_vm0 = vcmask 261120   ;;  %v547_v58 = vmov 0  }
  0x2c   :  { %408 = vmatprep.subr.bf16.mxu0 %v434_v1  ;;  %v71_v3 = vld [vmem:[#allocation3] sm:$0xff]  ;;  %v72_v4 = vld [vmem:[#allocation3 + $0x8] sm:$0xff]  ;;  %v73_v5 = vld [vmem:[#allocation3 + $0x10] sm:$0xff]  ;;  %433 = vset.pattern.permute.xlu0 %v547_v58  ;;  %vm356_vm1 = vcmask 130112   ;;  %vm367_vm2 = vcmask 1041409   ;;  %vm370_vm3 = vcmask 123904  }
  0x2d   :  { %409 = vmatpush3.bf16.msra.mxu0 %v434_v1  ;;  %v75_v6 = vpack.c.bf16 %v72_v4, %v71_v3  ;;  %v74_v7 = vld [vmem:[#allocation3 + $0x18] sm:$0xff]  ;;  %v437_v10 = vld [vmem:[#allocation8] sm:$0xff]  }
  0x2e   :  { %410 = vmatprep.subr.bf16.mxu0 %v435_v2  ;;  %v76_v8 = vpack.c.bf16 %v74_v7, %v73_v5  ;;  %v436_v9 = vld [vmem:[#allocation8 + $0x8] sm:$0xff]  }
  0x2f   :  { %412 = vmatprep.mubr.msk.bf16.mxu0 %vm100_vm0, %v75_v6  ;;  %416 = vmatprep.subr.bf16.mxu1 %v436_v9  ;;  %v388_v11 = vld [vmem:[%s619_s2] ss:$0 sm:$0xff] }
  0x30   :  { %417 = vmatpush3.bf16.msra.mxu1 %v436_v9  ;;  %v393_v59 = vld [vmem:[%s621_s4] ss:$0 sm:$0xff] }
  0x31   :  { %411 = vmatpush3.bf16.msra.mxu0 %v435_v2  ;;  %418 = vmatprep.subr.bf16.mxu1 %v437_v10 }
  0x34   :  { %413 = vmatmul.mubr.msk.bf16.vlgmr.msra.gmra.mxu0 %vm100_vm0, %v76_v8  ;;  %419 = vmatpush3.bf16.msra.mxu1 %v437_v10 }
  0xf4   :  { %v414_v12 = vpop.f32.mrf.mxu0 }
  0xf5   :  { %v150_v13 = vadd.f32 %v414_v12, %v388_v11 }
  0xf6   :  { %v141_v14 = vpop.f32.mrf.mxu0 }
  0xf7   :  { %v162_v15 = vmul.f32 0.044715, %v150_v13  ;;  %v142_v16 = vadd.f32 %v388_v11, %v141_v14  ;;  %v158_v51 = vmul.f32 0.5, %v150_v13 }
  0xf8   :  { %v415_v17 = vpop.f32.mrf.mxu0 }
  0xf9   :  { %v166_v18 = vmul.f32 %v162_v15, %v150_v13  ;;  %v160_v19 = vmul.f32 0.044715, %v142_v16  ;;  %v153_v20 = vadd.f32 %v415_v17, %v388_v11  ;;  %v156_v48 = vmul.f32 0.5, %v142_v16 }
  0xfa   :  { %v144_v21 = vpop.f32.mrf.mxu0 }
  0xfb   :  { %v170_v22 = vmul.f32 %v166_v18, %v150_v13  ;;  %v164_v23 = vmul.f32 %v160_v19, %v142_v16  ;;  %v163_v24 = vmul.f32 0.044715, %v153_v20  ;;  %v145_v25 = vadd.f32 %v388_v11, %v144_v21 }
  0xfc   :  { %v159_v46 = vmul.f32 0.5, %v153_v20 }
  0xfd   :  { %v174_v26 = vadd.f32 %v170_v22, %v150_v13  ;;  %v167_v27 = vmul.f32 %v163_v24, %v153_v20  ;;  %v161_v28 = vmul.f32 0.044715, %v145_v25  ;;  %v168_v29 = vmul.f32 %v164_v23, %v142_v16 }
  0xfe   :  { %v157_v49 = vmul.f32 0.5, %v145_v25 }
  0xff   :  { %v178_v30 = vmul.f32 0.7978846, %v174_v26  ;;  %v171_v31 = vmul.f32 %v167_v27, %v153_v20  ;;  %v165_v32 = vmul.f32 %v161_v28, %v145_v25  ;;  %v172_v33 = vadd.f32 %v168_v29, %v142_v16  ;;  %v398_v28 = vld [vmem:[%s622_s5] ss:$0 sm:$0xff]  ;;  %s548_s5 = smov [#allocation9]  }
 0x100   :  { %s378_s22 = sshll.u32 %s548_s5, 4  ;;  %s379_s22 = int_to_ptr.vmem [resolvable:$true] %s378_s22 }
 0x101   :  { %v175_v34 = vadd.f32 %v171_v31, %v153_v20  ;;  %v169_v35 = vmul.f32 %v165_v32, %v145_v25  ;;  %v176_v36 = vmul.f32 0.7978846, %v172_v33  ;;  %438 = vtanh.f32 %v178_v30  ;;  %s514_s23 = scalar_lea.vmem %s379_s22, 32  ;;  %p519_p2 = scmp.lt.s32.totalorder %s379_s22, %s379_s22 }
 0x102   :  { %p515_p1 = scmp.ne.s32.totalorder %s379_s22, %s514_s23  ;;  %p520_p3 = scmp.lt.s32.totalorder %s514_s23, %s514_s23 }
 0x103   :  { %v179_v37 = vmul.f32 0.7978846, %v175_v34  ;;  %v173_v38 = vadd.f32 %v169_v35, %v145_v25  ;;  %440 = vtanh.f32 %v176_v36 }
 0x104   :  { %p521_p4 = por %p520_p3, %p519_p2 }
 0x105   :  { %442 = vtanh.f32 %v179_v37  ;;  %v177_v39 = vmul.f32 0.7978846, %v173_v38 }
 0x106   :  { %p522_p5 = pnand %p521_p4, %p515_p1 }
 0x107   :  { %444 = vtanh.f32 %v177_v39 }
 0x10e   :  { %v439_v40 = vpop.eup %438 }
 0x10f   :  { %v186_v47 = vadd.f32 1.0, %v439_v40 }
 0x110   :  { %v441_v41 = vpop.eup %440 }
 0x111   :  { %v184_v43 = vadd.f32 1.0, %v441_v41  ;;  %v190_v55 = vmul.f32 %v186_v47, %v158_v51 }
 0x112   :  { %v443_v42 = vpop.eup %442 }
 0x113   :  { %v187_v44 = vadd.f32 1.0, %v443_v42  ;;  %v188_v53 = vmul.f32 %v184_v43, %v156_v48 }
 0x114   :  { %v445_v45 = vpop.eup %444 }
 0x115   :  { %v185_v50 = vadd.f32 1.0, %v445_v45  ;;  %v191_v52 = vmul.f32 %v187_v44, %v159_v46  ;;  %v399_v45 = vld [vmem:[#allocation2] ss:$0 sm:$0xff]  ;;  %v345_v46 = vlaneseq }
 0x117   :  { %v189_v54 = vmul.f32 %v185_v50, %v157_v49  ;;  %v193_v57 = vpack.c.bf16 %v191_v52, %v190_v55  ;;  %v346_v48 = vand.u32 127, %v345_v46  ;;  %v348_v50 = vshrl.u32 %v345_v46, 7 }
 0x119   :  { %v192_v56 = vpack.c.bf16 %v189_v54, %v188_v53  ;;  %v351_v51 = vadd.s32 4294967288, %v346_v48  ;;  %v349_v53 = vsub.s32 %v346_v48, %v348_v50 }
 0x11b   :  { %420 = vmatprep.mubr.msk.bf16.mxu1 %vm100_vm0, %v192_v56  ;;  %v354_v54 = vsub.s32 %v351_v51, %v348_v50 }
 0x11c   :  { %421 = vmatmul.mubr.msk.bf16.vlgmr.msra.gmra.mxu1 %vm100_vm0, %v193_v57 }
 0x1dc   :  { %v422_v60 = vpop.f32.mrf.mxu1 }
 0x1dd   :  { %v266_v61 = vadd.f32 %v422_v60, %v393_v59 }
 0x1de   :  { %v257_v62 = vpop.f32.mrf.mxu1 }
 0x1df   :  { %v278_v63 = vmul.f32 0.044715, %v266_v61  ;;  %v258_v0 = vadd.f32 %v393_v59, %v257_v62  ;;  %v274_v25 = vmul.f32 0.5, %v266_v61 }
 0x1e0   :  { %v423_v1 = vpop.f32.mrf.mxu1 }
 0x1e1   :  { %v276_v2 = vmul.f32 0.044715, %v258_v0  ;;  %v269_v3 = vadd.f32 %v423_v1, %v393_v59  ;;  %v282_v4 = vmul.f32 %v278_v63, %v266_v61  ;;  %v272_v30 = vmul.f32 0.5, %v258_v0 }
 0x1e2   :  { %v260_v5 = vpop.f32.mrf.mxu1 }
 0x1e3   :  { %v279_v6 = vmul.f32 0.044715, %v269_v3  ;;  %v261_v7 = vadd.f32 %v393_v59, %v260_v5  ;;  %v286_v8 = vmul.f32 %v282_v4, %v266_v61  ;;  %v280_v9 = vmul.f32 %v276_v2, %v258_v0 }
 0x1e4   :  { %v275_v35 = vmul.f32 0.5, %v269_v3 }
 0x1e5   :  { %v283_v10 = vmul.f32 %v279_v6, %v269_v3  ;;  %v277_v11 = vmul.f32 0.044715, %v261_v7  ;;  %v290_v12 = vadd.f32 %v286_v8, %v266_v61  ;;  %v284_v13 = vmul.f32 %v280_v9, %v258_v0 }
 0x1e6   :  { %v273_v40 = vmul.f32 0.5, %v261_v7 }
 0x1e7   :  { %v281_v14 = vmul.f32 %v277_v11, %v261_v7  ;;  %v294_v15 = vmul.f32 0.7978846, %v290_v12  ;;  %v288_v16 = vadd.f32 %v284_v13, %v258_v0  ;;  %v287_v17 = vmul.f32 %v283_v10, %v269_v3 }
 0x1e9   :  { %446 = vtanh.f32 %v294_v15  ;;  %v292_v18 = vmul.f32 0.7978846, %v288_v16  ;;  %v291_v19 = vadd.f32 %v287_v17, %v269_v3  ;;  %v285_v20 = vmul.f32 %v281_v14, %v261_v7 }
 0x1eb   :  { %448 = vtanh.f32 %v292_v18  ;;  %v295_v21 = vmul.f32 0.7978846, %v291_v19  ;;  %v289_v22 = vadd.f32 %v285_v20, %v261_v7 }
 0x1ed   :  { %450 = vtanh.f32 %v295_v21  ;;  %v293_v23 = vmul.f32 0.7978846, %v289_v22 }
 0x1ef   :  { %452 = vtanh.f32 %v293_v23 }
 0x1f6   :  { %v447_v24 = vpop.eup %446 }
 0x1f7   :  { %v302_v26 = vadd.f32 1.0, %v447_v24 }
 0x1f8   :  { %v449_v27 = vpop.eup %448 }
 0x1f9   :  { %v306_v29 = vmul.f32 %v302_v26, %v274_v25  ;;  %v300_v31 = vadd.f32 1.0, %v449_v27 }
 0x1fa   :  { %v451_v32 = vpop.eup %450 }
 0x1fb   :  { %v317_v33 = vmul.f32 %v398_v28, %v306_v29  ;;  %v304_v34 = vmul.f32 %v300_v31, %v272_v30  ;;  %v303_v36 = vadd.f32 1.0, %v451_v32 }
 0x1fc   :  { %v453_v37 = vpop.eup %452 }
 0x1fd   :  { %323 = vadd.xlane.f32.xlu1 %v317_v33  ;;  %v315_v38 = vmul.f32 %v398_v28, %v304_v34  ;;  %v307_v39 = vmul.f32 %v303_v36, %v275_v35  ;;  %v301_v41 = vadd.f32 1.0, %v453_v37 }
 0x1ff   :  { %319 = vadd.xlane.f32.xlu0 %v315_v38  ;;  %v318_v42 = vmul.f32 %v398_v28, %v307_v39  ;;  %v305_v43 = vmul.f32 %v301_v41, %v273_v40 }
 0x201   :  { %325 = vadd.xlane.f32.xlu1 %v318_v42  ;;  %v316_v44 = vmul.f32 %v398_v28, %v305_v43 }
 0x203   :  { %321 = vadd.xlane.f32.xlu0 %v316_v44 }
 0x219   :  { %334 = vperm.xlu0 %433, %v399_v45  }
 0x286   :  { %v324_v49 = vpop.xlane.xlu1 %323 }
 0x288   :  { %v320_v47 = vpop.xlane.xlu0 %319 }
 0x28a   :  { %v326_v55 = vpop.xlane.xlu1 %325 }
 0x28c   :  { %v322_v52 = vpop.xlane.xlu0 %321 }
 0x294   :  { %v335_v56 = vpop.permute.xlu0 %334 }
 0x295   :  { %v337_v57 = vadd.f32 %v335_v56, %v320_v47  ;;  %v338_v58 = vadd.f32 %v335_v56, %v322_v52  ;;  %v339_v59 = vadd.f32 %v335_v56, %v324_v49  ;;  %v340_v60 = vadd.f32 %v335_v56, %v326_v55 }
 0x297   :  { %v350_v61 = vrot.slane %v337_v57, %v349_v53  ;;  %v355_v62 = vrot.slane %v338_v58, %v354_v54  ;;  %v361_v63 = vrot.slane %v339_v59, %v349_v53  ;;  %v365_v0 = vrot.slane %v340_v60, %v354_v54 }
 0x299   :  { %v357_v1 = vsel %vm356_vm1, %v355_v62, %v350_v61  ;;  %v366_v2 = vsel %vm356_vm1, %v365_v0, %v361_v63 }
 0x29a   :  { %v368_v3 = vsel %vm367_vm2, %v366_v2, %v357_v1 }
 0x29b   :  { %371 = vst.msk [vmem:[#allocation9] sm:$0x3] %vm370_vm3, %v368_v3 }
 0x29c   :  { %525 = shalt.err (!%p522_p5)
}
 0x29d   :  { %381 = dma.vmem_to_hbm [thread:$0]  %s379_s22, 32, %s624_s7, [#allocation5]  }
 0x29e   :  { %538 = dma.done.wait [#allocation5], 32  }
 0x29f   :  { %539 = vsyncadd [#allocation5], 4294967264 }
 0x2a0   :  { %385 = vsyncpa [#allocation4], 1 }
 0x2a1   :  { %386 = vsyncpa [#allocation7], 1 }
 0x2a2   :  { %387 = vsyncpa [#allocation5], 1 }

</bundles_post_ra>
